<compile_context>
chip_gen: v6e
topology: v6e:2x2x1
jax: 0.10.0
libtpu: 0.0.40
codegen_flags: <defaults>
</compile_context>

<pallas_src>
import functools

import jax
import jax.numpy as jnp
from jax.experimental import pallas as pl
from jax.experimental.pallas import tpu as pltpu

_LANE = 128
_MIB = 1 << 20


def _round_up(x, m):
    return ((x + m - 1) // m) * m


def _round_down(x, m):
    return (x // m) * m


def _sublane(dtype):
    # Native sublane packing: 8 rows (f32), 16 (bf16), 32 (int8/fp8).
    return max(8, 32 // jnp.dtype(dtype).itemsize)


@functools.lru_cache(maxsize=1)
def _vmem_capacity_bytes():
    try:
        return int(pltpu.get_tpu_info().vmem_capacity_bytes)
    except Exception:
        return 64 * _MIB  # conservative default: v7x per-TC physical VMEM


def _vmem_limit_bytes():
    cap = _vmem_capacity_bytes()
    # ~78% of physical: ~100 MiB on v5e/v6e (128 MiB), ~50 MiB on v7x (64 MiB).
    return min(100 * _MIB, (cap // 32) * 25)


def _pick_ff_tile(d_ff, target):
    """Largest multiple of 128 dividing d_ff and <= target; d_ff itself if small.

    Returns None if no lane-aligned divisor exists (caller zero-pads d_ff).
    Never falls back to the full d_ff block for big d_ff — that would blow up
    VMEM (especially on v7x's 64 MiB) for real model sizes.
    """
    if d_ff <= target:
        return d_ff
    t = _round_down(target, _LANE)
    while t >= _LANE:
        if d_ff % t == 0:
            return t
        t -= _LANE
    return None


def _swiglu_kernel(x_ref, w1_ref, w3_ref, w2_ref, o_ref, acc_ref):
    # x_ref:  (tm, d_model)        w1_ref/w3_ref: (d_model, tf)
    # w2_ref: (tf, d_model)        o_ref: (tm, d_model)
    # acc_ref: (tm, d_model) f32 accumulator, resident across the d_ff axis.
    k = pl.program_id(1)

    @pl.when(k == 0)
    def _():
        acc_ref[...] = jnp.zeros_like(acc_ref)

    # Cast x to the weight dtype (no-op if identical) so the MXU uses its
    # native bf16 path when bf16 weights are supplied; accumulation stays f32.
    x = x_ref[...].astype(w1_ref.dtype)
    h1 = jnp.dot(x, w1_ref[...], preferred_element_type=jnp.float32)
    h3 = jnp.dot(x, w3_ref[...], preferred_element_type=jnp.float32)

    # swish(h1) * h3, computed in f32 for this d_ff chunk only; the (n, d_ff)
    # intermediate never materializes.
    gated = (h1 * jax.nn.sigmoid(h1)) * h3

    acc_ref[...] += jnp.dot(gated.astype(w2_ref.dtype), w2_ref[...],
                            preferred_element_type=jnp.float32)

    @pl.when(k == pl.num_programs(1) - 1)
    def _():
        o_ref[...] = acc_ref[...].astype(o_ref.dtype)


def prepare_swiglu_weights(w1, w2, w3, dtype=None):
    """One-time weight prep (do this at model init, not per call).

    - Transpose PyTorch Linear layout (out, in) -> kernel layout (in, out).
    - Optionally cast to a compute dtype (bf16 recommended: halves weight HBM
      traffic and uses the native MXU path on v5e/v6e/v7x).
    - Zero-pad d_ff up to a multiple of 128 so a lane-aligned d_ff tile always
      exists (mathematically exact: padded columns/rows contribute 0).
    """
    w1_t, w2_t, w3_t = w1.T, w2.T, w3.T
    if dtype is not None:
        w1_t, w2_t, w3_t = (w1_t.astype(dtype), w2_t.astype(dtype),
                            w3_t.astype(dtype))
    d_ff = w1_t.shape[1]
    pad = _round_up(d_ff, _LANE) - d_ff
    if pad:
        w1_t = jnp.pad(w1_t, ((0, 0), (0, pad)))
        w3_t = jnp.pad(w3_t, ((0, 0), (0, pad)))
        w2_t = jnp.pad(w2_t, ((0, pad), (0, 0)))
    return w1_t, w2_t, w3_t


@functools.partial(jax.jit, static_argnames=("tm", "tf"))
def swiglu_pallas(x, w1_t, w2_t, w3_t, *, tm=None, tf=None):
    """SwiGLU forward.

    x:    (..., d_model)
    w1_t: (d_model, d_ff)  -- pre-transposed (see prepare_swiglu_weights)
    w2_t: (d_ff, d_model)
    w3_t: (d_model, d_ff)
    tm / tf: optional row / d_ff tile overrides (defaults auto-size to VMEM).
    """
    d_model = x.shape[-1]
    d_ff = w1_t.shape[1]
    orig_shape = x.shape

    x2d = x.reshape(-1, d_model)
    n = x2d.shape[0]

    x_sz = jnp.dtype(x.dtype).itemsize
    w_sz = jnp.dtype(w1_t.dtype).itemsize

    vmem_limit = _vmem_limit_bytes()
    budget = (vmem_limit * 85) // 100  # headroom for Mosaic internal scratch

    # ---- d_ff tile (reduction axis, last in grid) -------------------------
    # Bound tf so double-buffered weight chunks (W1|W3|W2) use <= ~half budget.
    tf_target = 512 if tf is None else tf
    max_tf = max(_LANE,
                 _round_down((budget // 2) // max(6 * d_model * w_sz, 1), _LANE))
    tf_target = max(_LANE, min(tf_target, max_tf))
    tf_eff = _pick_ff_tile(d_ff, tf_target)
    if tf_eff is None:
        # No lane-aligned divisor: zero-pad d_ff in-call (exact). Prefer doing
        # this once via prepare_swiglu_weights() to avoid the per-call copy.
        d_ff_p = _round_up(d_ff, _LANE)
        pad = d_ff_p - d_ff
        w1_t = jnp.pad(w1_t, ((0, 0), (0, pad)))
        w3_t = jnp.pad(w3_t, ((0, 0), (0, pad)))
        w2_t = jnp.pad(w2_t, ((0, pad), (0, 0)))
        d_ff = d_ff_p
        tf_eff = _pick_ff_tile(d_ff, tf_target)  # 128 always divides now

    # ---- row tile (token axis, parallel) ----------------------------------
    # Weights are re-streamed from HBM once per row tile, so make tm as large
    # as the remaining VMEM budget allows (arithmetic intensity ~ tm).
    weight_buf_bytes = 6 * d_model * tf_eff * w_sz       # 3 chunks x 2 buffers
    per_row_bytes = d_model * (4 * x_sz + 4)             # x(2) + out(2) + f32 acc
    tm_budget = max(budget - weight_buf_bytes, 0) // max(per_row_bytes, 1)
    tm_eff = max(_LANE, _round_down(tm_budget, _LANE))
    tm_cap = 1024 if tm is None else _round_up(tm, _sublane(x.dtype))
    tm_eff = min(tm_eff, tm_cap)
    # TODO(synk): on v7x (2 TensorCores) also cap tm so the token-tile count is
    # >= 2 and even, keeping the megacore split balanced.

    pad_rows = 0
    if n < tm_eff:
        # Decode-style small n: one (possibly sublane-padded) token tile.
        tm_eff = _round_up(max(n, 1), _sublane(x.dtype))
        pad_rows = tm_eff - n
        if pad_rows:
            x2d = jnp.pad(x2d, ((0, pad_rows), (0, 0)))
    # else: grid = ceil(n / tm_eff); the partial last block is handled by Pallas
    # boundary masking (rows are independent through both matmuls, OOB stores
    # are dropped) — no full-x HBM pad copy.

    n_rows = n + pad_rows
    grid = (pl.cdiv(n_rows, tm_eff), d_ff // tf_eff)
    n_row_tiles = grid[0]

    # Honest cost estimate: weights are re-read once per row tile.
    cost = pl.CostEstimate(
        flops=6 * n * d_model * d_ff,            # 3 matmuls, 2 flops/MAC
        transcendentals=n * d_ff,                # sigmoid
        bytes_accessed=(2 * n * d_model * x_sz
                        + 3 * d_model * d_ff * w_sz * n_row_tiles),
    )

    footprint = tm_eff * d_model * (4 * x_sz + 4) + weight_buf_bytes
    vmem_limit_final = int(min(max(vmem_limit, footprint + 4 * _MIB),
                               (_vmem_capacity_bytes() * 15) // 16))

    out = pl.pallas_call(
        _swiglu_kernel,
        out_shape=jax.ShapeDtypeStruct((n_rows, d_model), x.dtype),
        grid_spec=pltpu.PrefetchScalarGridSpec(
            num_scalar_prefetch=0,
            grid=grid,
            in_specs=[
                pl.BlockSpec((tm_eff, d_model), lambda i, k: (i, 0)),
                pl.BlockSpec((d_model, tf_eff), lambda i, k: (0, k)),
                pl.BlockSpec((d_model, tf_eff), lambda i, k: (0, k)),
                pl.BlockSpec((tf_eff, d_model), lambda i, k: (k, 0)),
            ],
            out_specs=pl.BlockSpec((tm_eff, d_model), lambda i, k: (i, 0)),
            scratch_shapes=[pltpu.VMEM((tm_eff, d_model), jnp.float32)],
        ),
        compiler_params=pltpu.CompilerParams(
            dimension_semantics=("parallel", "arbitrary"),
            vmem_limit_bytes=vmem_limit_final,
        ),
        cost_estimate=cost,
    )(x2d, w1_t, w3_t, w2_t)

    if pad_rows:
        out = out[:n]
    return out.reshape(orig_shape)


def swiglu_pallas_torch_layout(x, w1, w2, w3, **kw):
    """Convenience wrapper taking PyTorch Linear weight layout (out, in)."""
    w1_t, w2_t, w3_t = prepare_swiglu_weights(w1, w2, w3)
    return swiglu_pallas(x, w1_t, w2_t, w3_t, **kw)


def swiglu_ref(x, w1, w2, w3):
    h1 = x @ w1.T
    h3 = x @ w3.T
    return ((h1 * jax.nn.sigmoid(h1)) * h3) @ w2.T


if __name__ == "__main__":
    key = jax.random.PRNGKey(0)

    # --- 1) toy shapes, exact f32 path, torch-layout convenience wrapper ----
    batch, seq, d_model, d_ff = 2, 8, 32, 64
    k_x, k_w1, k_w2, k_w3 = jax.random.split(key, 4)
    x = jax.random.normal(k_x, (batch, seq, d_model), dtype=jnp.float32)
    # PyTorch Linear weight layout: (out_features, in_features), no bias.
    w1 = jax.random.normal(k_w1, (d_ff, d_model), dtype=jnp.float32) * 0.05
    w2 = jax.random.normal(k_w2, (d_model, d_ff), dtype=jnp.float32) * 0.05
    w3 = jax.random.normal(k_w3, (d_ff, d_model), dtype=jnp.float32) * 0.05

    out = jax.block_until_ready(swiglu_pallas_torch_layout(x, w1, w2, w3))
    ref = swiglu_ref(x, w1, w2, w3)
    assert out.shape == (batch, seq, d_model)
    assert jnp.allclose(out, ref, atol=1e-4, rtol=1e-4)

    # --- 2) bf16 weights/activations, multi-chunk d_ff reduction, and a
    #        partial last token block (n=150 not a multiple of tm=128) -------
    batch2, seq2, dm2, dff2 = 2, 75, 128, 1024
    k_x2, k_w12, k_w22, k_w32 = jax.random.split(jax.random.PRNGKey(1), 4)
    x2 = jax.random.normal(k_x2, (batch2, seq2, dm2),
                           dtype=jnp.float32).astype(jnp.bfloat16)
    w12 = jax.random.normal(k_w12, (dff2, dm2), dtype=jnp.float32) * 0.02
    w22 = jax.random.normal(k_w22, (dm2, dff2), dtype=jnp.float32) * 0.02
    w32 = jax.random.normal(k_w32, (dff2, dm2), dtype=jnp.float32) * 0.02

    # Hoisted once at "model init": transpose + bf16 cast (+ d_ff pad if needed).
    w1_t, w2_t, w3_t = prepare_swiglu_weights(w12, w22, w32, dtype=jnp.bfloat16)
    out2 = jax.block_until_ready(swiglu_pallas(x2, w1_t, w2_t, w3_t,
                                               tm=128, tf=512))
    assert out2.shape == (batch2, seq2, dm2)

    # Reference in f32 on the same bf16-quantized inputs.
    ref2 = swiglu_ref(x2.astype(jnp.float32),
                      w12.astype(jnp.bfloat16).astype(jnp.float32),
                      w22.astype(jnp.bfloat16).astype(jnp.float32),
                      w32.astype(jnp.bfloat16).astype(jnp.float32))
    assert jnp.allclose(out2.astype(jnp.float32), ref2, atol=5e-3, rtol=2e-2)

    print("KERNEL_OK")
</pallas_src>

<mosaic_0001>
module attributes {stable_mosaic.version = 11 : i64} {
  func.func @_swiglu_kernel(%arg0: i32, %arg1: i32, %arg2: memref<16x32xf32, #tpu.memory_space<vmem>>, %arg3: memref<32x128xf32, #tpu.memory_space<vmem>>, %arg4: memref<32x128xf32, #tpu.memory_space<vmem>>, %arg5: memref<128x32xf32, #tpu.memory_space<vmem>>, %arg6: memref<16x32xf32, #tpu.memory_space<vmem>>, %arg7: memref<16x32xf32, #tpu.memory_space<vmem>>) attributes {dimension_semantics = [#tpu.dimension_semantics<parallel>, #tpu.dimension_semantics<arbitrary>], iteration_bounds = array<i64: 1, 1>, scalar_prefetch = 0 : i64, scratch_operands = 1 : i64, tpu.core_type = #tpu.core_type<tc>, window_params = [{transform_indices = @transform_0, window_bounds = array<i64: 16, 32>}, {transform_indices = @transform_1, window_bounds = array<i64: 32, 128>}, {transform_indices = @transform_2, window_bounds = array<i64: 32, 128>}, {transform_indices = @transform_3, window_bounds = array<i64: 128, 32>}, {transform_indices = @transform_4, window_bounds = array<i64: 16, 32>}]} {
    %c0_i32 = arith.constant 0 : i32
    %0 = arith.cmpi eq, %arg1, %c0_i32 : i32
    %1 = arith.extui %0 : i1 to i32
    %c0_i32_0 = arith.constant 0 : i32
    %2 = arith.cmpi ne, %1, %c0_i32_0 : i32
    scf.if %2 {
      %cst_17 = arith.constant 0.000000e+00 : f32
      %23 = vector.broadcast %cst_17 : f32 to vector<16x32xf32>
      %c0_18 = arith.constant 0 : index
      %c0_19 = arith.constant 0 : index
      %24 = vector.load %arg7[%c0_18, %c0_19] : memref<16x32xf32, #tpu.memory_space<vmem>>, vector<16x32xf32>
      tpu.vector_store %arg7[%c0_18, %c0_19], %23 {strides = array<i32>} : memref<16x32xf32, #tpu.memory_space<vmem>>, vector<16x32xf32>,
    } else {
    }
    %c0 = arith.constant 0 : index
    %c0_1 = arith.constant 0 : index
    %3 = vector.load %arg2[%c0, %c0_1] : memref<16x32xf32, #tpu.memory_space<vmem>>, vector<16x32xf32>
    %c0_2 = arith.constant 0 : index
    %c0_3 = arith.constant 0 : index
    %4 = vector.load %arg3[%c0_2, %c0_3] : memref<32x128xf32, #tpu.memory_space<vmem>>, vector<32x128xf32>
    %cst = arith.constant dense<0.000000e+00> : vector<16x128xf32>
    %5 = tpu.matmul %3, %4, %cst {dimension_numbers = #tpu.dot_dimension_numbers<[1], [0], [0], [1], [0, 0, 1, 1], [], []>} : vector<16x32xf32>, vector<32x128xf32>, vector<16x128xf32> -> vector<16x128xf32>
    %c0_4 = arith.constant 0 : index
    %c0_5 = arith.constant 0 : index
    %6 = vector.load %arg4[%c0_4, %c0_5] : memref<32x128xf32, #tpu.memory_space<vmem>>, vector<32x128xf32>
    %cst_6 = arith.constant dense<0.000000e+00> : vector<16x128xf32>
    %7 = tpu.matmul %3, %6, %cst_6 {dimension_numbers = #tpu.dot_dimension_numbers<[1], [0], [0], [1], [0, 0, 1, 1], [], []>} : vector<16x32xf32>, vector<32x128xf32>, vector<16x128xf32> -> vector<16x128xf32>
    %8 = arith.negf %5 : vector<16x128xf32>
    %9 = math.exp %8 : vector<16x128xf32>
    %cst_7 = arith.constant 1.000000e+00 : f32
    %10 = vector.broadcast %cst_7 : f32 to vector<16x128xf32>
    %11 = arith.addf %10, %9 : vector<16x128xf32>
    %12 = arith.divf %10, %11 : vector<16x128xf32>
    %13 = arith.mulf %5, %12 : vector<16x128xf32>
    %14 = arith.mulf %13, %7 : vector<16x128xf32>
    %c0_8 = arith.constant 0 : index
    %c0_9 = arith.constant 0 : index
    %15 = vector.load %arg7[%c0_8, %c0_9] : memref<16x32xf32, #tpu.memory_space<vmem>>, vector<16x32xf32>
    %c0_10 = arith.constant 0 : index
    %c0_11 = arith.constant 0 : index
    %16 = vector.load %arg5[%c0_10, %c0_11] : memref<128x32xf32, #tpu.memory_space<vmem>>, vector<128x32xf32>
    %cst_12 = arith.constant dense<0.000000e+00> : vector<16x32xf32>
    %17 = tpu.matmul %14, %16, %cst_12 {dimension_numbers = #tpu.dot_dimension_numbers<[1], [0], [0], [1], [0, 0, 1, 1], [], []>} : vector<16x128xf32>, vector<128x32xf32>, vector<16x32xf32> -> vector<16x32xf32>
    %18 = arith.addf %15, %17 : vector<16x32xf32>
    %c0_13 = arith.constant 0 : index
    %c0_14 = arith.constant 0 : index
    %19 = vector.load %arg7[%c0_13, %c0_14] : memref<16x32xf32, #tpu.memory_space<vmem>>, vector<16x32xf32>
    tpu.vector_store %arg7[%c0_13, %c0_14], %18 {strides = array<i32>} : memref<16x32xf32, #tpu.memory_space<vmem>>, vector<16x32xf32>,
    %c0_i32_15 = arith.constant 0 : i32
    %20 = arith.cmpi eq, %arg1, %c0_i32_15 : i32
    %21 = arith.extui %20 : i1 to i32
    %c0_i32_16 = arith.constant 0 : i32
    %22 = arith.cmpi ne, %21, %c0_i32_16 : i32
    scf.if %22 {
      %c0_17 = arith.constant 0 : index
      %c0_18 = arith.constant 0 : index
      %23 = vector.load %arg7[%c0_17, %c0_18] : memref<16x32xf32, #tpu.memory_space<vmem>>, vector<16x32xf32>
      %c0_19 = arith.constant 0 : index
      %c0_20 = arith.constant 0 : index
      %24 = vector.load %arg6[%c0_19, %c0_20] : memref<16x32xf32, #tpu.memory_space<vmem>>, vector<16x32xf32>
      tpu.vector_store %arg6[%c0_19, %c0_20], %23 {strides = array<i32>} : memref<16x32xf32, #tpu.memory_space<vmem>>, vector<16x32xf32>,
    } else {
    }
    return
  }
  func.func @transform_0(%arg0: i32, %arg1: i32) -> (i32, i32) {
    %c0_i32 = arith.constant 0 : i32
    %c0_i32_0 = arith.constant 0 : i32
    return %arg0, %c0_i32 : i32, i32
  }
  func.func @transform_1(%arg0: i32, %arg1: i32) -> (i32, i32) {
    %c0_i32 = arith.constant 0 : i32
    %c0_i32_0 = arith.constant 0 : i32
    return %c0_i32, %arg1 : i32, i32
  }
  func.func @transform_2(%arg0: i32, %arg1: i32) -> (i32, i32) {
    %c0_i32 = arith.constant 0 : i32
    %c0_i32_0 = arith.constant 0 : i32
    return %c0_i32, %arg1 : i32, i32
  }
  func.func @transform_3(%arg0: i32, %arg1: i32) -> (i32, i32) {
    %c0_i32 = arith.constant 0 : i32
    %c0_i32_0 = arith.constant 0 : i32
    return %arg1, %c0_i32 : i32, i32
  }
  func.func @transform_4(%arg0: i32, %arg1: i32) -> (i32, i32) {
    %c0_i32 = arith.constant 0 : i32
    %c0_i32_0 = arith.constant 0 : i32
    return %arg0, %c0_i32 : i32, i32
  }
}

</mosaic_0001>

<bundles_post_ra>
// kernel: swiglu_pallas.1
= control target key start
LH: loop header
LB: loop body
LE: loop exit
PB: predicated region body
PF: predicated region fallthrough
CT: control target
= control target key end

     0   :  { %vm22_vm0 = vcmask 261120   ;;  %s575_s0 = inlined_call_operand.vmem [shape: f32[16,32], index: 0, kind: input, shape index: {}]   ;;  %s576_s1 = inlined_call_operand.vmem [shape: f32[32,128], index: 1, kind: input, shape index: {}]   ;;  %s577_s2 = inlined_call_operand.vmem [shape: f32[32,128], index: 2, kind: input, shape index: {}]   ;;  %s578_s3 = inlined_call_operand.vmem [shape: f32[128,32], index: 3, kind: input, shape index: {}]   ;;  %s579_s4 = inlined_call_operand.hbm [shape: f32[16,32], index: 4, kind: output, shape index: {}]  }
   0x1   :  { %v30_v0 = vld [vmem:[%s576_s1 + $0x18] sm:$0xff]  ;;  %v29_v1 = vld [vmem:[%s576_s1 + $0x10] sm:$0xff]  ;;  %v25_v2 = vld [vmem:[%s575_s0] sm:$0xff] }
   0x2   :  { %364 = vmatprep.subr.mxu1 %v30_v0  ;;  %v28_v3 = vld [vmem:[%s576_s1 + $0x8] sm:$0xff]  ;;  %372 = vmatprep.mubr.msk.f32.mxu1 %vm22_vm0, %v25_v2 }
   0x3   :  { %365 = vmatpush3.msra.mxu1 %v30_v0 }
   0x4   :  { %366 = vmatprep.subr.mxu1 %v29_v1 }
   0x5   :  { %9 = vsyncpa [#allocation4], 0  ;;  %367 = vmatpush3.msra.mxu1 %v29_v1  ;;  %v27_v4 = vld [vmem:[%s576_s1] sm:$0xff]  ;;  %v26_v5 = vld [vmem:[%s575_s0 + $0x8] sm:$0xff]  ;;  %v455_v26 = vmov 0.0  }
   0x6   :  { %368 = vmatprep.subr.mxu1 %v28_v3  ;;  %v116_v6 = vld [vmem:[%s577_s2 + $0x18] sm:$0xff]  ;;  %v115_v7 = vld [vmem:[%s577_s2 + $0x10] sm:$0xff]  ;;  %v114_v8 = vld [vmem:[%s577_s2 + $0x8] sm:$0xff]  ;;  %24 = vst.msk [vmem:[#allocation2 + $0x8] sm:$0xff] %vm22_vm0, %v455_v26 }
   0x7   :  { %369 = vmatpush3.msra.mxu1 %v28_v3  ;;  %v113_v9 = vld [vmem:[%s577_s2] sm:$0xff]  ;;  %v225_v10 = vld [vmem:[%s578_s3 + $0x78] sm:$0xff]  ;;  %v224_v11 = vld [vmem:[%s578_s3 + $0x70] sm:$0xff]  ;;  %23 = vst.msk [vmem:[#allocation2] sm:$0xff] %vm22_vm0, %v455_v26 }
   0x8   :  { %370 = vmatprep.subr.mxu1 %v27_v4  ;;  %386 = vmatprep.subr.mxu0 %v225_v10  ;;  %v223_v12 = vld [vmem:[%s578_s3 + $0x68] sm:$0xff]  ;;  %v222_v13 = vld [vmem:[%s578_s3 + $0x60] sm:$0xff]  ;;  %v221_v14 = vld [vmem:[%s578_s3 + $0x58] sm:$0xff] }
   0x9   :  { %371 = vmatpush3.msra.mxu1 %v27_v4  ;;  %387 = vmatpush3.msra.mxu0 %v225_v10  ;;  %v220_v15 = vld [vmem:[%s578_s3 + $0x50] sm:$0xff]  ;;  %v219_v16 = vld [vmem:[%s578_s3 + $0x48] sm:$0xff]  ;;  %v218_v17 = vld [vmem:[%s578_s3 + $0x40] sm:$0xff] }
   0xa   :  { %373 = vmatmul.mubr.msk.f32.vlgmr.msra.gmra.mxu1 %vm22_vm0, %v26_v5  ;;  %375 = vmatprep.subr.mxu1 %v116_v6  ;;  %v217_v18 = vld [vmem:[%s578_s3 + $0x38] sm:$0xff]  ;;  %v216_v19 = vld [vmem:[%s578_s3 + $0x30] sm:$0xff]  ;;  %v215_v20 = vld [vmem:[%s578_s3 + $0x28] sm:$0xff] }
   0xb   :  { %376 = vmatpush3.msra.mxu1 %v116_v6  ;;  %383 = vmatprep.mubr.msk.f32.mxu1 %vm22_vm0, %v25_v2  ;;  %v214_v21 = vld [vmem:[%s578_s3 + $0x20] sm:$0xff]  ;;  %v213_v22 = vld [vmem:[%s578_s3 + $0x18] sm:$0xff]  ;;  %v212_v23 = vld [vmem:[%s578_s3 + $0x10] sm:$0xff] }
   0xc   :  { %377 = vmatprep.subr.mxu1 %v115_v7  ;;  %388 = vmatprep.subr.mxu0 %v224_v11  ;;  %v211_v24 = vld [vmem:[%s578_s3 + $0x8] sm:$0xff]  ;;  %v210_v25 = vld [vmem:[%s578_s3] sm:$0xff]  ;;  %s456_s3 = smov [#allocation3]  }
   0xd   :  { %378 = vmatpush3.msra.mxu1 %v115_v7  ;;  %389 = vmatpush3.msra.mxu0 %v224_v11  ;;  %v209_v43 = vld [vmem:[#allocation2 + $0x8] sm:$0xff]  ;;  %s317_s10 = sshll.u32 %s456_s3, 4  ;;  %s318_s10 = int_to_ptr.vmem [resolvable:$true] %s317_s10 }
   0xe   :  { %379 = vmatprep.subr.mxu1 %v114_v8  ;;  %390 = vmatprep.subr.mxu0 %v223_v12  ;;  %v208_v45 = vld [vmem:[#allocation2] sm:$0xff]  ;;  %s433_s11 = scalar_lea.vmem %s318_s10, 256  ;;  %p438_p1 = scmp.lt.s32.totalorder %s318_s10, %s318_s10 }
   0xf   :  { %380 = vmatpush3.msra.mxu1 %v114_v8  ;;  %391 = vmatpush3.msra.mxu0 %v223_v12  ;;  %p434_p0 = scmp.ne.s32.totalorder %s318_s10, %s433_s11  ;;  %p439_p2 = scmp.lt.s32.totalorder %s433_s11, %s433_s11 }
  0x10   :  { %381 = vmatprep.subr.mxu1 %v113_v9  ;;  %392 = vmatprep.subr.mxu0 %v222_v13 }
  0x11   :  { %382 = vmatpush3.msra.mxu1 %v113_v9  ;;  %393 = vmatpush3.msra.mxu0 %v222_v13  ;;  %p440_p3 = por %p439_p2, %p438_p1 }
  0x12   :  { %384 = vmatmul.mubr.msk.f32.vlgmr.msra.gmra.mxu1 %vm22_vm0, %v26_v5  ;;  %394 = vmatprep.subr.mxu0 %v221_v14 }
  0x13   :  { %395 = vmatpush3.msra.mxu0 %v221_v14  ;;  %p441_p4 = pnand %p440_p3, %p434_p0 }
  0x14   :  { %396 = vmatprep.subr.mxu0 %v220_v15 }
  0x15   :  { %397 = vmatpush3.msra.mxu0 %v220_v15 }
  0x16   :  { %398 = vmatprep.subr.mxu0 %v219_v16 }
  0x17   :  { %399 = vmatpush3.msra.mxu0 %v219_v16 }
  0x18   :  { %400 = vmatprep.subr.mxu0 %v218_v17 }
  0x19   :  { %401 = vmatpush3.msra.mxu0 %v218_v17 }
  0x1a   :  { %402 = vmatprep.subr.mxu0 %v217_v18 }
  0x1b   :  { %403 = vmatpush3.msra.mxu0 %v217_v18 }
  0x1c   :  { %404 = vmatprep.subr.mxu0 %v216_v19 }
  0x1d   :  { %405 = vmatpush3.msra.mxu0 %v216_v19 }
  0x1e   :  { %406 = vmatprep.subr.mxu0 %v215_v20 }
  0x1f   :  { %407 = vmatpush3.msra.mxu0 %v215_v20 }
  0x20   :  { %408 = vmatprep.subr.mxu0 %v214_v21 }
  0x21   :  { %409 = vmatpush3.msra.mxu0 %v214_v21 }
  0x22   :  { %410 = vmatprep.subr.mxu0 %v213_v22 }
  0x23   :  { %411 = vmatpush3.msra.mxu0 %v213_v22 }
  0x24   :  { %412 = vmatprep.subr.mxu0 %v212_v23 }
  0x25   :  { %413 = vmatpush3.msra.mxu0 %v212_v23 }
  0x26   :  { %414 = vmatprep.subr.mxu0 %v211_v24 }
  0x27   :  { %415 = vmatpush3.msra.mxu0 %v211_v24 }
  0x28   :  { %416 = vmatprep.subr.mxu0 %v210_v25 }
  0x29   :  { %417 = vmatpush3.msra.mxu0 %v210_v25 }
  0xca   :  { %v374_v27 = vpop.f32.mrf.mxu1 }
  0xcb   :  { %v333_v28 = vmul.f32 -1.442695, %v374_v27 }
  0xcc   :  { %v104_v29 = vpop.f32.mrf.mxu1 }
  0xcd   :  { %425 = vpow2.f32 %v333_v28  ;;  %v332_v30 = vmul.f32 -1.442695, %v104_v29 }
  0xcf   :  { %427 = vpow2.f32 %v332_v30 }
  0xd2   :  { %v385_v36 = vpop.f32.mrf.mxu1 }
  0xd4   :  { %v183_v40 = vpop.f32.mrf.mxu1 }
  0xda   :  { %v426_v31 = vpop.eup %425 }
  0xdb   :  { %v199_v32 = vadd.f32 1.0, %v426_v31 }
  0xdc   :  { %v428_v33 = vpop.eup %427 }
  0xdd   :  { %429 = vrcp.f32 %v199_v32  ;;  %v198_v34 = vadd.f32 1.0, %v428_v33 }
  0xdf   :  { %431 = vrcp.f32 %v198_v34 }
  0xea   :  { %v430_v35 = vpop.eup %429 }
  0xeb   :  { %v205_v38 = vmul.f32 %v430_v35, %v374_v27 }
  0xec   :  { %v432_v37 = vpop.eup %431 }
  0xed   :  { %v204_v39 = vmul.f32 %v432_v37, %v104_v29  ;;  %v207_v42 = vmul.f32 %v385_v36, %v205_v38 }
  0xef   :  { %v206_v41 = vmul.f32 %v204_v39, %v183_v40 }
  0xf1   :  { %418 = vmatprep.mubr.f32.mxu0 %v206_v41 }
  0xf2   :  { %419 = vmatmul.mubr.f32.vlgmr.msra.gmra.mxu0 %v207_v42 }
 0x1b2   :  { %v420_v44 = vpop.f32.mrf.mxu0 }
 0x1b3   :  { %v302_v46 = vadd.f32 %v420_v44, %v209_v43 }
 0x1b4   :  { %v292_v47 = vpop.f32.mrf.mxu0 }
 0x1b5   :  { %304 = vst.msk [vmem:[#allocation2 + $0x8] sm:$0xff] %vm22_vm0, %v302_v46  ;;  %v301_v48 = vadd.f32 %v292_v47, %v208_v45 }
 0x1b7   :  { %303 = vst.msk [vmem:[#allocation2] sm:$0xff] %vm22_vm0, %v301_v48 }
 0x1bc   :  { %v309_v49 = vld [vmem:[#allocation2 + $0x8] sm:$0xff] }
 0x1bd   :  { %311 = vst.msk [vmem:[#allocation3 + $0x8] sm:$0xff] %vm22_vm0, %v309_v49 }
 0x1be   :  { %v308_v50 = vld [vmem:[#allocation2] sm:$0xff] }
 0x1bf   :  { %310 = vst.msk [vmem:[#allocation3] sm:$0xff] %vm22_vm0, %v308_v50 }
 0x1c0   :  { %444 = shalt.err (!%p441_p4)
}
 0x1c1   :  { %s457_s2 = smov 128   ;;  %s458_s12 = smov 8  }
 0x1c2   :  { %323 = dma.vmem_to_hbm [thread:$0]  %s318_s10, 256, %s579_s4, [#allocation4], %s457_s2, %s457_s2, %s458_s12  }
 0x1c3   :  { %453 = dma.done.wait [#allocation4], 256  }
 0x1c4   :  { %454 = vsyncadd [#allocation4], 4294967040 }
 0x1c5   :  { %327 = vsyncpa [#allocation4], 1 }

</bundles_post_ra>
